<compile_context>
chip_gen: v7x
topology: tpu7x:2x2x1
jax: 0.10.0
libtpu: 0.0.40
codegen_flags: <defaults>
</compile_context>

<pallas_src>
import functools

import jax
import jax.numpy as jnp
from jax import lax
from jax.experimental import pallas as pl
from jax.experimental.pallas import tpu as pltpu

EPS = 1e-5
LANES = 128


def _round_up(n, m):
    return (n + m - 1) // m * m


def _pick_batch_block(n, h, ho, kp, ncols):
    """Largest batch tile tn (divisor of N) such that:
      * the grid stays >= 2 when N >= 2 (v7x two-TensorCore split),
      * per-step VMEM (double-buffered x + acc scratch + double-buffered output) stays modest,
      * the MXU M dimension tn*Ho stays within a sane cap."""
    best = 1
    for tn in range(1, n + 1):
        if n % tn:
            continue
        if n >= 2 and n // tn < 2:
            continue
        rows = tn * ho
        if rows > 1024:
            continue
        blk_bytes = 2 * (tn * h * kp * 2) + 3 * (rows * ncols * 4)
        if blk_bytes > (24 << 20):
            continue
        best = tn
    return best


def _accumulate_conv(x_ref, w_ref, acc_ref, *, kh, ho):
    """Conv as KH banded bf16 MXU matmuls, accumulated in a VMEM f32 scratch.

    x_ref:   (TN, H, Kp)        bf16 activations, W*Cin packed (and lane-padded) into Kp
    w_ref:   (KH, Kp, ncols)    bf16 banded (block-Toeplitz) weight, ncols = pad(Wo*Cout, 128)
    acc_ref: (TN*Ho, ncols)     f32 VMEM accumulator
    """
    tn, _, kp = x_ref.shape
    x = x_ref[...]                                  # already bf16 (cast in wrapper)
    acc_ref[...] = jnp.dot(x[:, 0:ho, :].reshape(tn * ho, kp), w_ref[0],
                           preferred_element_type=jnp.float32)
    for dy in range(1, kh):
        acc_ref[...] += jnp.dot(x[:, dy:dy + ho, :].reshape(tn * ho, kp), w_ref[dy],
                                preferred_element_type=jnp.float32)


def _conv_stats_kernel(x_ref, w_ref, stats_ref, acc_ref, *, kh, ho):
    """Pass 1: conv into VMEM scratch, emit per-block (sum, sum-of-squares) only."""
    _accumulate_conv(x_ref, w_ref, acc_ref, kh=kh, ho=ho)
    acc = acc_ref[...]
    s1 = jnp.sum(acc, axis=0, keepdims=True)            # (1, ncols)
    s2 = jnp.sum(acc * acc, axis=0, keepdims=True)       # (1, ncols)
    stats = jnp.concatenate([s1, s2], axis=0)            # (2, ncols)
    stats_ref[...] = stats.reshape(stats_ref.shape)      # single full-block store


def _conv_bn_relu_kernel(x_ref, w_ref, scale_ref, shift_ref, o_ref, acc_ref, *, kh, ho):
    """Pass 2: recompute conv, apply folded BN (y*scale + shift) and ReLU, store lane-dense."""
    _accumulate_conv(x_ref, w_ref, acc_ref, kh=kh, ho=ho)
    y = acc_ref[...] * scale_ref[...] + shift_ref[...]    # f32 elementwise
    y = jnp.maximum(y, 0.0)
    o_ref[...] = y.reshape(o_ref.shape).astype(o_ref.dtype)


def cnn_block_forward_nhwc(x_nhwc, weight_oihw, gamma, beta, *, batch_block=None):
    """CNNBlock forward in NHWC (steady-state layout). Returns (N, Ho, Wo, Cout)."""
    N, H, W, Cin = x_nhwc.shape
    Cout, Cin_w, KH, KW = weight_oihw.shape
    assert Cin_w == Cin
    Ho, Wo = H - KH + 1, W - KW + 1

    cols = Wo * Cout                       # real output columns, j = wo*Cout + co
    ncols = _round_up(cols, LANES)         # joint lane padding (not per-channel padding)
    K = W * Cin                            # packed contraction dim
    Kp = _round_up(K, LANES)               # lane/MXU-K padded contraction dim

    tn = batch_block if batch_block is not None else _pick_batch_block(N, H, Ho, Kp, ncols)
    assert N % tn == 0
    nb = N // tn

    # ---- one-off weight prep (plain XLA): banded / block-Toeplitz weight slab ---------------
    # w_band[dy, w*Cin + ci, wo*Cout + co] = weight[co, ci, dy, w - wo]  if 0 <= w - wo < KW
    w_hwio = jnp.transpose(weight_oihw, (2, 3, 1, 0)).astype(jnp.float32)  # (KH, KW, Cin, Cout)
    w_band = jnp.zeros((KH, W, Cin, Wo, Cout), jnp.float32)
    for dx in range(KW):
        for wo in range(Wo):
            w_band = w_band.at[:, wo + dx, :, wo, :].set(w_hwio[:, dx, :, :])
    w_band = w_band.reshape(KH, K, cols)
    w_band = jnp.pad(w_band, ((0, 0), (0, Kp - K), (0, ncols - cols))).astype(jnp.bfloat16)

    # Pack W and Cin into the lane dim, cast to bf16 and lane-pad (fuses with the NHWC
    # transpose in the wrapper; padded contraction rows of w_band are zero so numerics match).
    x_p = x_nhwc.reshape(N, H, K).astype(jnp.bfloat16)
    if Kp != K:
        x_p = jnp.pad(x_p, ((0, 0), (0, 0), (0, Kp - K)))

    # ---- VMEM budget: derived from actual block sizes, capped for v7x's 64 MiB physical -----
    x_blk = tn * H * Kp * 2
    w_blk = KH * Kp * ncols * 2
    io_blk = tn * Ho * ncols * 4
    need = 2 * (x_blk + w_blk) + io_blk + 2 * io_blk + 4 * (2 * ncols * 4)
    vmem_limit = int(min(max(4 * need, 32 << 20), 48 << 20))
    # Note: v6e/v5e (128 MiB VMEM) could raise this cap further; 48 MiB is safe everywhere.
    # The constant-index w_band spec could use pipeline_mode=pl.Buffered(1) to save one copy.

    compiler_params = pltpu.CompilerParams(
        dimension_semantics=("parallel",), vmem_limit_bytes=vmem_limit)

    # ---- pass 1: conv (VMEM-resident only) + per-block BN partial statistics -----------------
    stats = pl.pallas_call(
        functools.partial(_conv_stats_kernel, kh=KH, ho=Ho),
        grid=(nb,),
        in_specs=[
            pl.BlockSpec((tn, H, Kp), lambda i: (i, 0, 0)),
            pl.BlockSpec((KH, Kp, ncols), lambda i: (0, 0, 0)),
        ],
        out_specs=pl.BlockSpec((1, 2, ncols), lambda i: (i, 0, 0)),
        out_shape=jax.ShapeDtypeStruct((nb, 2, ncols), jnp.float32),
        scratch_shapes=[pltpu.VMEM((tn * Ho, ncols), jnp.float32)],
        compiler_params=compiler_params,
    )(x_p, w_band)

    # ---- finalize global batch statistics (tiny XLA fold), bake BN into scale/shift ----------
    cnt = jnp.float32(N * Ho * Wo)
    stot = jnp.sum(stats, axis=0)[:, :cols].reshape(2, Wo, Cout).sum(axis=1)  # (2, Cout)
    mean = stot[0] / cnt
    var = jnp.maximum(stot[1] / cnt - mean * mean, 0.0)   # biased var (BN training mode)
    inv_std = lax.rsqrt(var + EPS)
    scale_c = gamma.astype(jnp.float32) * inv_std
    shift_c = beta.astype(jnp.float32) - mean * scale_c
    scale = jnp.pad(jnp.tile(scale_c, Wo), (0, ncols - cols)).reshape(1, ncols)
    shift = jnp.pad(jnp.tile(shift_c, Wo), (0, ncols - cols)).reshape(1, ncols)

    # ---- pass 2: recompute conv + folded BN + ReLU, lane-dense output -------------------------
    out = pl.pallas_call(
        functools.partial(_conv_bn_relu_kernel, kh=KH, ho=Ho),
        grid=(nb,),
        in_specs=[
            pl.BlockSpec((tn, H, Kp), lambda i: (i, 0, 0)),
            pl.BlockSpec((KH, Kp, ncols), lambda i: (0, 0, 0)),
            pl.BlockSpec((1, ncols), lambda i: (0, 0)),
            pl.BlockSpec((1, ncols), lambda i: (0, 0)),
        ],
        out_specs=pl.BlockSpec((tn, Ho, ncols), lambda i: (i, 0, 0)),
        out_shape=jax.ShapeDtypeStruct((N, Ho, ncols), x_nhwc.dtype),
        scratch_shapes=[pltpu.VMEM((tn * Ho, ncols), jnp.float32)],
        compiler_params=compiler_params,
    )(x_p, w_band, scale, shift)

    # Un-pad the lane dimension (layout plumbing only).
    return out[..., :cols].reshape(N, Ho, Wo, Cout)


@jax.jit
def cnn_block_forward(x_nchw, weight, gamma, beta):
    """PyTorch-layout wrapper: NCHW in / NCHW out. Steady-state users should call the NHWC path."""
    x_nhwc = jnp.transpose(x_nchw, (0, 2, 3, 1))
    out_nhwc = cnn_block_forward_nhwc(x_nhwc, weight, gamma, beta)
    return jnp.transpose(out_nhwc, (0, 3, 1, 2))


def reference_forward(x_nchw, weight, gamma, beta, conv_dtype=jnp.float32):
    """Pure-JAX reference for Conv2d(bias=False) -> BatchNorm2d(training mode) -> ReLU."""
    xr = x_nchw.astype(conv_dtype).astype(jnp.float32)
    wr = weight.astype(conv_dtype).astype(jnp.float32)
    y = lax.conv_general_dilated(
        xr, wr, window_strides=(1, 1), padding="VALID",
        dimension_numbers=("NCHW", "OIHW", "NCHW"),
        precision=lax.Precision.HIGHEST)
    mean = jnp.mean(y, axis=(0, 2, 3), keepdims=True)
    var = jnp.mean((y - mean) ** 2, axis=(0, 2, 3), keepdims=True)
    y = (y - mean) * lax.rsqrt(var + EPS)
    y = y * gamma.reshape(1, -1, 1, 1) + beta.reshape(1, -1, 1, 1)
    return jnp.maximum(y, 0.0)


if __name__ == "__main__":
    # Small shapes consistent with the module: N=2, Cin=4, H=W=16, Cout=8, k=3.
    N, Cin, H, W = 2, 4, 16, 16
    Cout, K = 8, 3

    key = jax.random.PRNGKey(0)
    kx, kw = jax.random.split(key)
    x = jax.random.normal(kx, (N, Cin, H, W), dtype=jnp.float32)
    weight = jax.random.normal(kw, (Cout, Cin, K, K), dtype=jnp.float32) * 0.1
    gamma = jnp.ones((Cout,), jnp.float32)   # nn.BatchNorm2d default weight
    beta = jnp.zeros((Cout,), jnp.float32)   # nn.BatchNorm2d default bias

    out = jax.block_until_ready(cnn_block_forward(x, weight, gamma, beta))
    assert out.shape == (N, Cout, H - K + 1, W - K + 1), out.shape

    # Tight check vs a reference with matching numerics (conv operands rounded to bf16,
    # f32 accumulation and f32 BN statistics).
    ref_bf16 = reference_forward(x, weight, gamma, beta, conv_dtype=jnp.bfloat16)
    err_tight = float(jnp.max(jnp.abs(out - ref_bf16)))
    assert jnp.allclose(out, ref_bf16, atol=1e-3, rtol=1e-3), err_tight

    # Loose sanity check vs the pure-f32 PyTorch-equivalent reference (bf16 MXU operands
    # introduce ~1e-2 relative error pre-normalization).
    ref_f32 = reference_forward(x, weight, gamma, beta, conv_dtype=jnp.float32)
    err_loose = float(jnp.max(jnp.abs(out - ref_f32)))
    assert jnp.allclose(out, ref_f32, atol=5e-2, rtol=5e-2), err_loose

    print("KERNEL_OK")
</pallas_src>

<mosaic_0001>
module attributes {stable_mosaic.version = 11 : i64} {
  func.func @_conv_stats_kernel(%arg0: i32, %arg1: memref<1x16x128xbf16, #tpu.memory_space<vmem>>, %arg2: memref<3x128x128xbf16, #tpu.memory_space<vmem>>, %arg3: memref<1x2x128xf32, #tpu.memory_space<vmem>>, %arg4: memref<14x128xf32, #tpu.memory_space<vmem>>) attributes {dimension_semantics = [#tpu.dimension_semantics<parallel>], iteration_bounds = array<i64: 2>, scalar_prefetch = 0 : i64, scratch_operands = 1 : i64, tpu.core_type = #tpu.core_type<tc>, window_params = [{transform_indices = @transform_0, window_bounds = array<i64: 1, 16, 128>}, {pipeline_mode = #tpu.pipeline_mode<synchronous>, transform_indices = @transform_1, window_bounds = array<i64: 3, 128, 128>}, {transform_indices = @transform_2, window_bounds = array<i64: 1, 2, 128>}]} {
    %c0 = arith.constant 0 : index
    %c0_0 = arith.constant 0 : index
    %c0_1 = arith.constant 0 : index
    %0 = vector.load %arg1[%c0, %c0_0, %c0_1] : memref<1x16x128xbf16, #tpu.memory_space<vmem>>, vector<1x16x128xbf16>
    %1 = vector.extract_strided_slice %0 {offsets = [0, 0, 0], sizes = [1, 14, 128], strides = [1, 1, 1]} : vector<1x16x128xbf16> to vector<1x14x128xbf16>
    %2 = vector.shape_cast %1 : vector<1x14x128xbf16> to vector<14x128xbf16>
    %c0_2 = arith.constant 0 : index
    %c0_3 = arith.constant 0 : index
    %c0_4 = arith.constant 0 : index
    %3 = vector.load %arg2[%c0_2, %c0_3, %c0_4] : memref<3x128x128xbf16, #tpu.memory_space<vmem>>, vector<1x128x128xbf16>
    %4 = vector.shape_cast %3 : vector<1x128x128xbf16> to vector<128x128xbf16>
    %cst = arith.constant dense<0.000000e+00> : vector<14x128xf32>
    %5 = tpu.matmul %2, %4, %cst {dimension_numbers = #tpu.dot_dimension_numbers<[1], [0], [0], [1], [0, 0, 1, 1], [], []>} : vector<14x128xbf16>, vector<128x128xbf16>, vector<14x128xf32> -> vector<14x128xf32>
    %c0_5 = arith.constant 0 : index
    %c0_6 = arith.constant 0 : index
    %6 = vector.load %arg4[%c0_5, %c0_6] : memref<14x128xf32, #tpu.memory_space<vmem>>, vector<14x128xf32>
    tpu.vector_store %arg4[%c0_5, %c0_6], %5 {strides = array<i32>} : memref<14x128xf32, #tpu.memory_space<vmem>>, vector<14x128xf32>,
    %c0_7 = arith.constant 0 : index
    %c0_8 = arith.constant 0 : index
    %7 = vector.load %arg4[%c0_7, %c0_8] : memref<14x128xf32, #tpu.memory_space<vmem>>, vector<14x128xf32>
    %8 = vector.extract_strided_slice %0 {offsets = [0, 1, 0], sizes = [1, 14, 128], strides = [1, 1, 1]} : vector<1x16x128xbf16> to vector<1x14x128xbf16>
    %9 = vector.shape_cast %8 : vector<1x14x128xbf16> to vector<14x128xbf16>
    %c1 = arith.constant 1 : index
    %c0_9 = arith.constant 0 : index
    %c0_10 = arith.constant 0 : index
    %10 = vector.load %arg2[%c1, %c0_9, %c0_10] : memref<3x128x128xbf16, #tpu.memory_space<vmem>>, vector<1x128x128xbf16>
    %11 = vector.shape_cast %10 : vector<1x128x128xbf16> to vector<128x128xbf16>
    %cst_11 = arith.constant dense<0.000000e+00> : vector<14x128xf32>
    %12 = tpu.matmul %9, %11, %cst_11 {dimension_numbers = #tpu.dot_dimension_numbers<[1], [0], [0], [1], [0, 0, 1, 1], [], []>} : vector<14x128xbf16>, vector<128x128xbf16>, vector<14x128xf32> -> vector<14x128xf32>
    %13 = arith.addf %7, %12 : vector<14x128xf32>
    %c0_12 = arith.constant 0 : index
    %c0_13 = arith.constant 0 : index
    %14 = vector.load %arg4[%c0_12, %c0_13] : memref<14x128xf32, #tpu.memory_space<vmem>>, vector<14x128xf32>
    tpu.vector_store %arg4[%c0_12, %c0_13], %13 {strides = array<i32>} : memref<14x128xf32, #tpu.memory_space<vmem>>, vector<14x128xf32>,
    %c0_14 = arith.constant 0 : index
    %c0_15 = arith.constant 0 : index
    %15 = vector.load %arg4[%c0_14, %c0_15] : memref<14x128xf32, #tpu.memory_space<vmem>>, vector<14x128xf32>
    %16 = vector.extract_strided_slice %0 {offsets = [0, 2, 0], sizes = [1, 14, 128], strides = [1, 1, 1]} : vector<1x16x128xbf16> to vector<1x14x128xbf16>
    %17 = vector.shape_cast %16 : vector<1x14x128xbf16> to vector<14x128xbf16>
    %c2 = arith.constant 2 : index
    %c0_16 = arith.constant 0 : index
    %c0_17 = arith.constant 0 : index
    %18 = vector.load %arg2[%c2, %c0_16, %c0_17] : memref<3x128x128xbf16, #tpu.memory_space<vmem>>, vector<1x128x128xbf16>
    %19 = vector.shape_cast %18 : vector<1x128x128xbf16> to vector<128x128xbf16>
    %cst_18 = arith.constant dense<0.000000e+00> : vector<14x128xf32>
    %20 = tpu.matmul %17, %19, %cst_18 {dimension_numbers = #tpu.dot_dimension_numbers<[1], [0], [0], [1], [0, 0, 1, 1], [], []>} : vector<14x128xbf16>, vector<128x128xbf16>, vector<14x128xf32> -> vector<14x128xf32>
    %21 = arith.addf %15, %20 : vector<14x128xf32>
    %c0_19 = arith.constant 0 : index
    %c0_20 = arith.constant 0 : index
    %22 = vector.load %arg4[%c0_19, %c0_20] : memref<14x128xf32, #tpu.memory_space<vmem>>, vector<14x128xf32>
    tpu.vector_store %arg4[%c0_19, %c0_20], %21 {strides = array<i32>} : memref<14x128xf32, #tpu.memory_space<vmem>>, vector<14x128xf32>,
    %c0_21 = arith.constant 0 : index
    %c0_22 = arith.constant 0 : index
    %23 = vector.load %arg4[%c0_21, %c0_22] : memref<14x128xf32, #tpu.memory_space<vmem>>, vector<14x128xf32>
    %cst_23 = arith.constant dense<0.000000e+00> : vector<128xf32>
    %24 = vector.multi_reduction <add>, %23, %cst_23 [0] : vector<14x128xf32> to vector<128xf32>
    %25 = vector.shape_cast %24 : vector<128xf32> to vector<1x128xf32>
    %26 = arith.mulf %23, %23 : vector<14x128xf32>
    %cst_24 = arith.constant dense<0.000000e+00> : vector<128xf32>
    %27 = vector.multi_reduction <add>, %26, %cst_24 [0] : vector<14x128xf32> to vector<128xf32>
    %28 = vector.shape_cast %27 : vector<128xf32> to vector<1x128xf32>
    %29 = tpu.concatenate %25, %28 in 0 : vector<1x128xf32>, vector<1x128xf32> -> vector<2x128xf32>
    %30 = vector.shape_cast %29 : vector<2x128xf32> to vector<1x2x128xf32>
    %c0_25 = arith.constant 0 : index
    %c0_26 = arith.constant 0 : index
    %c0_27 = arith.constant 0 : index
    %31 = vector.load %arg3[%c0_25, %c0_26, %c0_27] : memref<1x2x128xf32, #tpu.memory_space<vmem>>, vector<1x2x128xf32>
    tpu.vector_store %arg3[%c0_25, %c0_26, %c0_27], %30 {strides = array<i32>} : memref<1x2x128xf32, #tpu.memory_space<vmem>>, vector<1x2x128xf32>,
    return
  }
  func.func @transform_0(%arg0: i32) -> (i32, i32, i32) {
    %c0_i32 = arith.constant 0 : i32
    %c0_i32_0 = arith.constant 0 : i32
    %c0_i32_1 = arith.constant 0 : i32
    return %arg0, %c0_i32, %c0_i32_0 : i32, i32, i32
  }
  func.func @transform_1(%arg0: i32) -> (i32, i32, i32) {
    %c0_i32 = arith.constant 0 : i32
    %c0_i32_0 = arith.constant 0 : i32
    %c0_i32_1 = arith.constant 0 : i32
    %c0_i32_2 = arith.constant 0 : i32
    return %c0_i32, %c0_i32_0, %c0_i32_1 : i32, i32, i32
  }
  func.func @transform_2(%arg0: i32) -> (i32, i32, i32) {
    %c0_i32 = arith.constant 0 : i32
    %c0_i32_0 = arith.constant 0 : i32
    %c0_i32_1 = arith.constant 0 : i32
    return %arg0, %c0_i32, %c0_i32_0 : i32, i32, i32
  }
}

module attributes {stable_mosaic.version = 11 : i64} {
  func.func @_conv_bn_relu_kernel(%arg0: i32, %arg1: memref<1x16x128xbf16, #tpu.memory_space<vmem>>, %arg2: memref<3x128x128xbf16, #tpu.memory_space<vmem>>, %arg3: memref<1x128xf32, #tpu.memory_space<vmem>>, %arg4: memref<1x128xf32, #tpu.memory_space<vmem>>, %arg5: memref<1x14x128xf32, #tpu.memory_space<vmem>>, %arg6: memref<14x128xf32, #tpu.memory_space<vmem>>) attributes {dimension_semantics = [#tpu.dimension_semantics<parallel>], iteration_bounds = array<i64: 2>, scalar_prefetch = 0 : i64, scratch_operands = 1 : i64, tpu.core_type = #tpu.core_type<tc>, window_params = [{transform_indices = @transform_0, window_bounds = array<i64: 1, 16, 128>}, {pipeline_mode = #tpu.pipeline_mode<synchronous>, transform_indices = @transform_1, window_bounds = array<i64: 3, 128, 128>}, {pipeline_mode = #tpu.pipeline_mode<synchronous>, transform_indices = @transform_2, window_bounds = array<i64: 1, 128>}, {pipeline_mode = #tpu.pipeline_mode<synchronous>, transform_indices = @transform_3, window_bounds = array<i64: 1, 128>}, {transform_indices = @transform_4, window_bounds = array<i64: 1, 14, 128>}]} {
    %c0 = arith.constant 0 : index
    %c0_0 = arith.constant 0 : index
    %c0_1 = arith.constant 0 : index
    %0 = vector.load %arg1[%c0, %c0_0, %c0_1] : memref<1x16x128xbf16, #tpu.memory_space<vmem>>, vector<1x16x128xbf16>
    %1 = vector.extract_strided_slice %0 {offsets = [0, 0, 0], sizes = [1, 14, 128], strides = [1, 1, 1]} : vector<1x16x128xbf16> to vector<1x14x128xbf16>
    %2 = vector.shape_cast %1 : vector<1x14x128xbf16> to vector<14x128xbf16>
    %c0_2 = arith.constant 0 : index
    %c0_3 = arith.constant 0 : index
    %c0_4 = arith.constant 0 : index
    %3 = vector.load %arg2[%c0_2, %c0_3, %c0_4] : memref<3x128x128xbf16, #tpu.memory_space<vmem>>, vector<1x128x128xbf16>
    %4 = vector.shape_cast %3 : vector<1x128x128xbf16> to vector<128x128xbf16>
    %cst = arith.constant dense<0.000000e+00> : vector<14x128xf32>
    %5 = tpu.matmul %2, %4, %cst {dimension_numbers = #tpu.dot_dimension_numbers<[1], [0], [0], [1], [0, 0, 1, 1], [], []>} : vector<14x128xbf16>, vector<128x128xbf16>, vector<14x128xf32> -> vector<14x128xf32>
    %c0_5 = arith.constant 0 : index
    %c0_6 = arith.constant 0 : index
    %6 = vector.load %arg6[%c0_5, %c0_6] : memref<14x128xf32, #tpu.memory_space<vmem>>, vector<14x128xf32>
    tpu.vector_store %arg6[%c0_5, %c0_6], %5 {strides = array<i32>} : memref<14x128xf32, #tpu.memory_space<vmem>>, vector<14x128xf32>,
    %c0_7 = arith.constant 0 : index
    %c0_8 = arith.constant 0 : index
    %7 = vector.load %arg6[%c0_7, %c0_8] : memref<14x128xf32, #tpu.memory_space<vmem>>, vector<14x128xf32>
    %8 = vector.extract_strided_slice %0 {offsets = [0, 1, 0], sizes = [1, 14, 128], strides = [1, 1, 1]} : vector<1x16x128xbf16> to vector<1x14x128xbf16>
    %9 = vector.shape_cast %8 : vector<1x14x128xbf16> to vector<14x128xbf16>
    %c1 = arith.constant 1 : index
    %c0_9 = arith.constant 0 : index
    %c0_10 = arith.constant 0 : index
    %10 = vector.load %arg2[%c1, %c0_9, %c0_10] : memref<3x128x128xbf16, #tpu.memory_space<vmem>>, vector<1x128x128xbf16>
    %11 = vector.shape_cast %10 : vector<1x128x128xbf16> to vector<128x128xbf16>
    %cst_11 = arith.constant dense<0.000000e+00> : vector<14x128xf32>
    %12 = tpu.matmul %9, %11, %cst_11 {dimension_numbers = #tpu.dot_dimension_numbers<[1], [0], [0], [1], [0, 0, 1, 1], [], []>} : vector<14x128xbf16>, vector<128x128xbf16>, vector<14x128xf32> -> vector<14x128xf32>
    %13 = arith.addf %7, %12 : vector<14x128xf32>
    %c0_12 = arith.constant 0 : index
    %c0_13 = arith.constant 0 : index
    %14 = vector.load %arg6[%c0_12, %c0_13] : memref<14x128xf32, #tpu.memory_space<vmem>>, vector<14x128xf32>
    tpu.vector_store %arg6[%c0_12, %c0_13], %13 {strides = array<i32>} : memref<14x128xf32, #tpu.memory_space<vmem>>, vector<14x128xf32>,
    %c0_14 = arith.constant 0 : index
    %c0_15 = arith.constant 0 : index
    %15 = vector.load %arg6[%c0_14, %c0_15] : memref<14x128xf32, #tpu.memory_space<vmem>>, vector<14x128xf32>
    %16 = vector.extract_strided_slice %0 {offsets = [0, 2, 0], sizes = [1, 14, 128], strides = [1, 1, 1]} : vector<1x16x128xbf16> to vector<1x14x128xbf16>
    %17 = vector.shape_cast %16 : vector<1x14x128xbf16> to vector<14x128xbf16>
    %c2 = arith.constant 2 : index
    %c0_16 = arith.constant 0 : index
    %c0_17 = arith.constant 0 : index
    %18 = vector.load %arg2[%c2, %c0_16, %c0_17] : memref<3x128x128xbf16, #tpu.memory_space<vmem>>, vector<1x128x128xbf16>
    %19 = vector.shape_cast %18 : vector<1x128x128xbf16> to vector<128x128xbf16>
    %cst_18 = arith.constant dense<0.000000e+00> : vector<14x128xf32>
    %20 = tpu.matmul %17, %19, %cst_18 {dimension_numbers = #tpu.dot_dimension_numbers<[1], [0], [0], [1], [0, 0, 1, 1], [], []>} : vector<14x128xbf16>, vector<128x128xbf16>, vector<14x128xf32> -> vector<14x128xf32>
    %21 = arith.addf %15, %20 : vector<14x128xf32>
    %c0_19 = arith.constant 0 : index
    %c0_20 = arith.constant 0 : index
    %22 = vector.load %arg6[%c0_19, %c0_20] : memref<14x128xf32, #tpu.memory_space<vmem>>, vector<14x128xf32>
    tpu.vector_store %arg6[%c0_19, %c0_20], %21 {strides = array<i32>} : memref<14x128xf32, #tpu.memory_space<vmem>>, vector<14x128xf32>,
    %c0_21 = arith.constant 0 : index
    %c0_22 = arith.constant 0 : index
    %23 = vector.load %arg6[%c0_21, %c0_22] : memref<14x128xf32, #tpu.memory_space<vmem>>, vector<14x128xf32>
    %c0_23 = arith.constant 0 : index
    %c0_24 = arith.constant 0 : index
    %24 = vector.load %arg3[%c0_23, %c0_24] : memref<1x128xf32, #tpu.memory_space<vmem>>, vector<1x128xf32>
    %25 = vector.broadcast %24 : vector<1x128xf32> to vector<14x128xf32>
    %26 = arith.mulf %23, %25 : vector<14x128xf32>
    %c0_25 = arith.constant 0 : index
    %c0_26 = arith.constant 0 : index
    %27 = vector.load %arg4[%c0_25, %c0_26] : memref<1x128xf32, #tpu.memory_space<vmem>>, vector<1x128xf32>
    %28 = vector.broadcast %27 : vector<1x128xf32> to vector<14x128xf32>
    %29 = arith.addf %26, %28 : vector<14x128xf32>
    %cst_27 = arith.constant 0.000000e+00 : f32
    %30 = vector.broadcast %cst_27 : f32 to vector<14x128xf32>
    %31 = arith.maximumf %29, %30 : vector<14x128xf32>
    %32 = vector.shape_cast %31 : vector<14x128xf32> to vector<1x14x128xf32>
    %c0_28 = arith.constant 0 : index
    %c0_29 = arith.constant 0 : index
    %c0_30 = arith.constant 0 : index
    %33 = vector.load %arg5[%c0_28, %c0_29, %c0_30] : memref<1x14x128xf32, #tpu.memory_space<vmem>>, vector<1x14x128xf32>
    tpu.vector_store %arg5[%c0_28, %c0_29, %c0_30], %32 {strides = array<i32>} : memref<1x14x128xf32, #tpu.memory_space<vmem>>, vector<1x14x128xf32>,
    return
  }
  func.func @transform_0(%arg0: i32) -> (i32, i32, i32) {
    %c0_i32 = arith.constant 0 : i32
    %c0_i32_0 = arith.constant 0 : i32
    %c0_i32_1 = arith.constant 0 : i32
    return %arg0, %c0_i32, %c0_i32_0 : i32, i32, i32
  }
  func.func @transform_1(%arg0: i32) -> (i32, i32, i32) {
    %c0_i32 = arith.constant 0 : i32
    %c0_i32_0 = arith.constant 0 : i32
    %c0_i32_1 = arith.constant 0 : i32
    %c0_i32_2 = arith.constant 0 : i32
    return %c0_i32, %c0_i32_0, %c0_i32_1 : i32, i32, i32
  }
  func.func @transform_2(%arg0: i32) -> (i32, i32) {
    %c0_i32 = arith.constant 0 : i32
    %c0_i32_0 = arith.constant 0 : i32
    %c0_i32_1 = arith.constant 0 : i32
    return %c0_i32, %c0_i32_0 : i32, i32
  }
  func.func @transform_3(%arg0: i32) -> (i32, i32) {
    %c0_i32 = arith.constant 0 : i32
    %c0_i32_0 = arith.constant 0 : i32
    %c0_i32_1 = arith.constant 0 : i32
    return %c0_i32, %c0_i32_0 : i32, i32
  }
  func.func @transform_4(%arg0: i32) -> (i32, i32, i32) {
    %c0_i32 = arith.constant 0 : i32
    %c0_i32_0 = arith.constant 0 : i32
    %c0_i32_1 = arith.constant 0 : i32
    return %arg0, %c0_i32, %c0_i32_0 : i32, i32, i32
  }
}

</mosaic_0001>

<bundles_post_ra>
// kernel: tile.13
= control target key start
LH: loop header
LB: loop body
LE: loop exit
PB: predicated region body
PF: predicated region fallthrough
CT: control target
= control target key end

     0   :  { %s28_s0 = inlined_call_operand.vmem [shape: f32[8], index: 0, kind: input, shape index: {}]   ;;  %s29_s1 = inlined_call_operand.vmem [shape: f32[14,8], index: 1, kind: output, shape index: {}]  }
   0x1   :  { %v4_v0 = vld [vmem:[%s28_s0] ss:$0 sm:$0xff] }
   0x2   :  { %5 = vst [vmem:[%s29_s1] sm:$0xff] %v4_v0  ;;  %8 = vst [vmem:[%s29_s1 + $0x8] sm:$0xff] %v4_v0 }

// kernel: tile.14
= control target key start
LH: loop header
LB: loop body
LE: loop exit
PB: predicated region body
PF: predicated region fallthrough
CT: control target
= control target key end

     0   :  { %s115_s10 = smov 104   ;;  %s116_s11 = smov 88   ;;  %vm3_vm0 = vcmask 64512   ;;  %vm9_vm1 = vcmask 917312   ;;  %vm15_vm2 = vcmask 851712   ;;  %vm21_vm3 = vcmask 786112   ;;  %s183_s0 = inlined_call_operand.vmem [shape: f32[14,8], index: 0, kind: input, shape index: {}]   ;;  %s184_s1 = inlined_call_operand.vmem [shape: f32[112], index: 1, kind: output, shape index: {}]  }
   0x1   :  { %v89_v0 = vld [vmem:[%s183_s0 + $0xd] sm:$0x1]   ;;  %v91_v1 = vld [vmem:[%s183_s0 + $0xb] sm:$0x1]   ;;  %v90_v2 = vld [vmem:[%s183_s0 + $0xc] sm:$0x1]  }
   0x2   :  { %7 = vrot.lane.b32.xlu0 %v89_v0, %s115_s10  ;;  %19 = vrot.lane.b32.xlu1 %v91_v1, %s116_s11  ;;  %v92_v3 = vld [vmem:[%s183_s0 + $0xa] sm:$0x1]   ;;  %s117_s16 = smov 96   ;;  %s118_s17 = smov 80   ;;  %v93_v4 = vld [vmem:[%s183_s0 + $0x9] sm:$0x1]  }
   0x3   :  { %v94_v5 = vld [vmem:[%s183_s0 + $0x8] sm:$0x1]   ;;  %v2_v6 = vld [vmem:[%s183_s0] sm:$0x1]   ;;  %s119_s24 = smov 72   ;;  %s120_s25 = smov 64  }
   0x4   :  { %4 = vst.msk [vmem:[#allocation0] sm:$0x1] %vm3_vm0, %v2_v6   ;;  %v95_v7 = vld [vmem:[%s183_s0 + $0x7] sm:$0x1]   ;;  %v96_v8 = vld [vmem:[%s183_s0 + $0x6] sm:$0x1]  }
   0x5   :  { %s121_s30 = smov 56   ;;  %s122_s2 = smov 48   ;;  %v97_v9 = vld [vmem:[%s183_s0 + $0x5] sm:$0x1]   ;;  %v98_v10 = vld [vmem:[%s183_s0 + $0x4] sm:$0x1]  }
   0x6   :  { %13 = vrot.lane.b32.xlu0 %v90_v2, %s117_s16  ;;  %25 = vrot.lane.b32.xlu1 %v92_v3, %s118_s17  ;;  %s123_s7 = smov 40   ;;  %s124_s8 = smov 32   ;;  %v99_v11 = vld [vmem:[%s183_s0 + $0x3] sm:$0x1]   ;;  %v100_v12 = vld [vmem:[%s183_s0 + $0x2] sm:$0x1]  }
   0x7   :  { %s125_s13 = smov 24   ;;  %s126_s14 = smov 16   ;;  %v101_v13 = vld [vmem:[%s183_s0 + $0x1] sm:$0x1]   ;;  %vm27_vm4 = vcmask 720512   ;;  %vm33_vm5 = vcmask 654912  }
   0x8   :  { %s127_s0 = smov 8   ;;  %vm39_vm6 = vcmask 589312   ;;  %vm45_vm7 = vcmask 523712   ;;  %vm51_vm8 = vcmask 458112   ;;  %vm57_vm9 = vcmask 392512  }
   0x9   :  { %vm63_vm10 = vcmask 326912   ;;  %vm69_vm11 = vcmask 261312   ;;  %vm75_vm12 = vcmask 195712   ;;  %vm81_vm13 = vcmask 130112  }
   0xa   :  { %31 = vrot.lane.b32.xlu0 %v93_v4, %s119_s24  ;;  %37 = vrot.lane.b32.xlu1 %v94_v5, %s120_s25 }
   0xe   :  { %43 = vrot.lane.b32.xlu0 %v95_v7, %s121_s30  ;;  %49 = vrot.lane.b32.xlu1 %v96_v8, %s122_s2 }
  0x12   :  { %55 = vrot.lane.b32.xlu0 %v97_v9, %s123_s7  ;;  %61 = vrot.lane.b32.xlu1 %v98_v10, %s124_s8 }
  0x16   :  { %67 = vrot.lane.b32.xlu0 %v99_v11, %s125_s13  ;;  %73 = vrot.lane.b32.xlu1 %v100_v12, %s126_s14 }
  0x1a   :  { %79 = vrot.lane.b32.xlu0 %v101_v13, %s127_s0 }
  0x74   :  { %v8_v14 = vpop.permute.xlu0 %7   ;;  %v20_v15 = vpop.permute.xlu1 %19  }
  0x75   :  { %10 = vst.msk [vmem:[#allocation0] sm:$0x1] %vm9_vm1, %v8_v14  }
  0x78   :  { %v14_v16 = vpop.permute.xlu0 %13   ;;  %v26_v17 = vpop.permute.xlu1 %25  }
  0x79   :  { %16 = vst.msk [vmem:[#allocation0] sm:$0x1] %vm15_vm2, %v14_v16  }
  0x7a   :  { %22 = vst.msk [vmem:[#allocation0] sm:$0x1] %vm21_vm3, %v20_v15  }
  0x7b   :  { %28 = vst.msk [vmem:[#allocation0] sm:$0x1] %vm27_vm4, %v26_v17  }
  0x7c   :  { %v32_v18 = vpop.permute.xlu0 %31   ;;  %v38_v19 = vpop.permute.xlu1 %37  }
  0x7d   :  { %34 = vst.msk [vmem:[#allocation0] sm:$0x1] %vm33_vm5, %v32_v18  }
  0x7e   :  { %40 = vst.msk [vmem:[#allocation0] sm:$0x1] %vm39_vm6, %v38_v19  }
  0x80   :  { %v44_v20 = vpop.permute.xlu0 %43   ;;  %v50_v21 = vpop.permute.xlu1 %49  }
  0x81   :  { %46 = vst.msk [vmem:[#allocation0] sm:$0x1] %vm45_vm7, %v44_v20  }
  0x82   :  { %52 = vst.msk [vmem:[#allocation0] sm:$0x1] %vm51_vm8, %v50_v21  }
  0x84   :  { %v56_v22 = vpop.permute.xlu0 %55   ;;  %v62_v23 = vpop.permute.xlu1 %61  }
  0x85   :  { %58 = vst.msk [vmem:[#allocation0] sm:$0x1] %vm57_vm9, %v56_v22  }
  0x86   :  { %64 = vst.msk [vmem:[#allocation0] sm:$0x1] %vm63_vm10, %v62_v23  }
  0x88   :  { %v68_v24 = vpop.permute.xlu0 %67   ;;  %v74_v25 = vpop.permute.xlu1 %73  }
  0x89   :  { %70 = vst.msk [vmem:[#allocation0] sm:$0x1] %vm69_vm11, %v68_v24  }
  0x8a   :  { %76 = vst.msk [vmem:[#allocation0] sm:$0x1] %vm75_vm12, %v74_v25  }
  0x8c   :  { %v80_v26 = vpop.permute.xlu0 %79  }
  0x8d   :  { %82 = vst.msk [vmem:[#allocation0] sm:$0x1] %vm81_vm13, %v80_v26  }
  0x94   :  { %v86_v27 = vld [vmem:[#allocation0] sm:$0x1] }
  0x95   :  { %88 = vst [vmem:[%s184_s1] sm:$0x1] %v86_v27 }

// kernel: cnn_block_forward.2
= control target key start
LH: loop header
LB: loop body
LE: loop exit
PB: predicated region body
PF: predicated region fallthrough
CT: control target
= control target key end

     0   :  { %s784_s9 = smov 0   ;;  %s907_s0 = inlined_call_operand.vmem [shape: bf16[2,16,128], index: 0, kind: input, shape index: {}]   ;;  %s908_s1 = inlined_call_operand.vmem [shape: bf16[3,128,128], index: 1, kind: input, shape index: {}]   ;;  %s909_s2 = inlined_call_operand.vmem [shape: f32[2,2,128], index: 2, kind: output, shape index: {}]  }
   0x1 LB: > { %s569_s10 = sadd.s32 4294967295, %s765_s9   ;;  %p573_p0 = scmp.ge.s32.totalorder %s765_s9, 1  ;;  %s765_s9 = sphi %s784_s9, %s12_s9  }
   0x2   : > { %p112_p1 = scmp.lt.s32.totalorder %s765_s9, 3 }
   0x4   : > { %p113_p2 = pnand %p573_p0, %p112_p1 }
   0x5   : > { %v734_v0 = vld [vmem:[%s908_s1] sm:$0xff] (!%p113_p2)   ;;  %v767_v1 = vmov (!%p113_p2), 0.0   ;;  %v735_v2 = vld [vmem:[%s908_s1 + $0x8] sm:$0xff] (!%p113_p2)   ;;  %vm768_vm0 = vmmov (!%p113_p2), 0   ;;  %p133_p3 = scmp.lt.s32.totalorder (!%p113_p2), %s569_s10, 1  ;;  %v736_v5 = vld [vmem:[%s908_s1 + $0x10] sm:$0xff] (!%p113_p2)  }
   0x6   : > { %116 = sbr.rel (%p113_p2) target bundleno = 313 (0x139), region = 28  ;;  %664 = vmatprep.subr.bf16.mxu0 (!%p113_p2), %v767_v1  ;;  %684 = vmatprep.subr.bf16.mxu1 (!%p113_p2), %v767_v1  ;;  %v737_v3 = vld [vmem:[%s908_s1 + $0x40] sm:$0xff] (!%p113_p2)   ;;  %v739_v4 = vld [vmem:[%s908_s1 + $0x48] sm:$0xff] (!%p113_p2)   ;;  %v741_v6 = vld [vmem:[%s908_s1 + $0x50] sm:$0xff] (!%p113_p2)   ;;  %vm494_vm1 = vcmask (!%p113_p2), 1045504   ;;  %vm513_vm2 = vcmask (!%p113_p2), 1040384  }
   0x7   : > { %665 = vmatpush3.bf16.msra.mxu0 (!%p113_p2), %v734_v0  ;;  %680 = vmatprep.mubr.msk.bf16.mxu0 (!%p113_p2), %vm768_vm0, %v767_v1  ;;  %v738_v7 = vld [vmem:[%s908_s1 + $0x18] sm:$0xff] (!%p113_p2)   ;;  %v740_v9 = vld [vmem:[%s908_s1 + $0x20] sm:$0xff] (!%p113_p2)   ;;  %v742_v11 = vld [vmem:[%s908_s1 + $0x28] sm:$0xff] (!%p113_p2)  }
   0x8   : > { %666 = vmatprep.subr.bf16.mxu0 (!%p113_p2), %v767_v1  ;;  %700 = vmatprep.mubr.msk.bf16.mxu1 (!%p113_p2), %vm768_vm0, %v767_v1  ;;  %v743_v8 = vld [vmem:[%s908_s1 + $0x58] sm:$0xff] (!%p113_p2)   ;;  %v745_v10 = vld [vmem:[%s908_s1 + $0x60] sm:$0xff] (!%p113_p2)   ;;  %v747_v13 = vld [vmem:[%s908_s1 + $0x68] sm:$0xff] (!%p113_p2)  }
   0x9   : > { %685 = vmatpush3.bf16.msra.mxu1 (!%p113_p2), %v737_v3  ;;  %v744_v14 = vld [vmem:[%s908_s1 + $0x30] sm:$0xff] (!%p113_p2)   ;;  %v746_v17 = vld [vmem:[%s908_s1 + $0x38] sm:$0xff] (!%p113_p2)   ;;  %v750_v21 = vld [vmem:[%s908_s1 + $0x80] sm:$0xff] (!%p113_p2)  }
   0xa   : > { %686 = vmatprep.subr.bf16.mxu1 (!%p113_p2), %v767_v1  ;;  %v749_v16 = vld [vmem:[%s908_s1 + $0x70] sm:$0xff] (!%p113_p2)   ;;  %v751_v20 = vld [vmem:[%s908_s1 + $0x78] sm:$0xff] (!%p113_p2)   ;;  %v752_v23 = vld [vmem:[%s908_s1 + $0x88] sm:$0xff] (!%p113_p2)  }
   0xb   : > { %667 = vmatpush3.bf16.msra.mxu0 (!%p113_p2), %v735_v2  ;;  %v753_v24 = vld [vmem:[%s908_s1 + $0x90] sm:$0xff] (!%p113_p2)   ;;  %v754_v25 = vld [vmem:[%s908_s1 + $0x98] sm:$0xff] (!%p113_p2)   ;;  %v755_v26 = vld [vmem:[%s908_s1 + $0xa0] sm:$0xff] (!%p113_p2)  }
   0xc   : > { %668 = vmatprep.subr.bf16.mxu0 (!%p113_p2), %v767_v1  ;;  %v756_v27 = vld [vmem:[%s908_s1 + $0xa8] sm:$0xff] (!%p113_p2)   ;;  %v757_v28 = vld [vmem:[%s908_s1 + $0xb0] sm:$0xff] (!%p113_p2)   ;;  %v758_v29 = vld [vmem:[%s908_s1 + $0xb8] sm:$0xff] (!%p113_p2)  }
   0xd   : > { %s911_s10 = smov (!%p133_p3, %s569_s10), 1  ;;  %687 = vmatpush3.bf16.msra.mxu1 %v739_v4 }
   0xe   : > { %688 = vmatprep.subr.bf16.mxu1 %v767_v1  ;;  %s636_s25 = sshll.u32 %s911_s10, 3  ;;  %s576_s11 = sshll.u32 %s911_s10, 1 }
   0xf   : > { %669 = vmatpush3.bf16.msra.mxu0 %v736_v5  ;;  %s137_s30 = scalar_lea.vmem %s907_s0, %s636_s25  ;;  %s141_s14 = scalar_lea.vmem %s909_s2, %s576_s11 }
  0x10   : > { %670 = vmatprep.subr.bf16.mxu0 %v767_v1  ;;  %v748_v12 = vld [vmem:[%s137_s30] sm:$0xff]  }
  0x11   : > { %689 = vmatpush3.bf16.msra.mxu1 %v741_v6  ;;  %v280_v15 = vshll.u32 %v748_v12, 16  ;;  %v278_v18 = vshrl.u32 %v748_v12, 16  ;;  %v397_v30 = vrot.slane %v748_v12, 1 }
  0x12   : > { %690 = vmatprep.subr.bf16.mxu1 %v767_v1 }
  0x13   : > { %671 = vmatpush3.bf16.msra.mxu0 %v738_v7  ;;  %v282_v19 = vrot.slane %v280_v15, 1 }
  0x14   : > { %672 = vmatprep.subr.bf16.mxu0 %v767_v1 }
  0x15   : > { %691 = vmatpush3.bf16.msra.mxu1 %v743_v8  ;;  %v283_v22 = vor.u32 %v282_v19, %v278_v18 }
  0x16   : > { %692 = vmatprep.subr.bf16.mxu1 %v767_v1 }
  0x17   : > { %673 = vmatpush3.bf16.msra.mxu0 %v740_v9 }
  0x18   : > { %674 = vmatprep.subr.bf16.mxu0 %v767_v1 }
  0x19   : > { %693 = vmatpush3.bf16.msra.mxu1 %v745_v10 }
  0x1a   : > { %694 = vmatprep.subr.bf16.mxu1 %v767_v1 }
  0x1b   : > { %675 = vmatpush3.bf16.msra.mxu0 %v742_v11 }
  0x1c   : > { %676 = vmatprep.subr.bf16.mxu0 %v767_v1 }
  0x1d   : > { %695 = vmatpush3.bf16.msra.mxu1 %v747_v13 }
  0x1e   : > { %696 = vmatprep.subr.bf16.mxu1 %v767_v1 }
  0x1f   : > { %677 = vmatpush3.bf16.msra.mxu0 %v744_v14 }
  0x20   : > { %678 = vmatprep.subr.bf16.mxu0 %v767_v1 }
  0x21   : > { %697 = vmatpush3.bf16.msra.mxu1 %v749_v16 }
  0x22   : > { %698 = vmatprep.subr.bf16.mxu1 %v767_v1 }
  0x23   : > { %679 = vmatpush3.bf16.msra.mxu0 %v746_v17 }
  0x24   : > { %704 = vmatprep.subr.bf16.mxu0 %v767_v1 }
  0x25   : > { %699 = vmatpush3.bf16.msra.mxu1 %v751_v20 }
  0x26   : > { %681 = vmatmul.mubr.bf16.vlgmr.msra.gmra.mrb[0].mxu0 %v748_v12 }
  0x27   : > { %705 = vmatpush3.bf16.msra.mxu0 %v750_v21  ;;  %720 = vmatprep.mubr.msk.bf16.mxu0 %vm768_vm0, %v767_v1 }
  0x28   : > { %706 = vmatprep.subr.bf16.mxu0 %v767_v1  ;;  %701 = vmatmul.mubr.bf16.vlgmr.msra.gmra.mrb[0].mxu1 %v283_v22 }
  0x2b   : > { %707 = vmatpush3.bf16.msra.mxu0 %v752_v23 }
  0x2c   : > { %708 = vmatprep.subr.bf16.mxu0 %v767_v1 }
  0x2f   : > { %709 = vmatpush3.bf16.msra.mxu0 %v753_v24 }
  0x30   : > { %710 = vmatprep.subr.bf16.mxu0 %v767_v1 }
  0x33   : > { %711 = vmatpush3.bf16.msra.mxu0 %v754_v25 }
  0x34   : > { %712 = vmatprep.subr.bf16.mxu0 %v767_v1 }
  0x37   : > { %713 = vmatpush3.bf16.msra.mxu0 %v755_v26 }
  0x38   : > { %714 = vmatprep.subr.bf16.mxu0 %v767_v1 }
  0x3b   : > { %715 = vmatpush3.bf16.msra.mxu0 %v756_v27 }
  0x3c   : > { %716 = vmatprep.subr.bf16.mxu0 %v767_v1 }
  0x3f   : > { %717 = vmatpush3.bf16.msra.mxu0 %v757_v28 }
  0x40   : > { %718 = vmatprep.subr.bf16.mxu0 %v767_v1 }
  0x43   : > { %719 = vmatpush3.bf16.msra.mxu0 %v758_v29 }
  0x46   : > { %721 = vmatmul.mubr.bf16.vlgmr.msra.gmra.mrb[4].mxu0 %v397_v30 }
  0xf9   : > { %v249_v31 = vpop.f32.mrb[0].mxu0 }
  0xfa   : > { %v682_v32 = vpop.f32.mrb[1].mxu0 }
  0xfb   : > { %v252_v33 = vpop.f32.mrb[2].mxu0  ;;  %v367_v35 = vpop.f32.mrb[0].mxu1 }
  0xfc   : > { %257 = vst [vmem:[#allocation2 + $0x8] sm:$0x3f] %v252_v33  ;;  %v683_v34 = vpop.f32.mrb[3].mxu0  ;;  %v374_v36 = vadd.f32 %v367_v35, %v249_v31  ;;  %v702_v37 = vpop.f32.mrb[1].mxu1 }
  0xfd   : > { %v370_v38 = vpop.f32.mrb[2].mxu1 }
  0xfe   : > { %v703_v39 = vpop.f32.mrb[3].mxu1 }
 0x103   : > { %v259_v40 = vld [vmem:[#allocation2 + $0x8] sm:$0x3f] }
 0x104   : > { %v375_v41 = vadd.f32 %v370_v38, %v259_v40 }
 0x106   : > { %377 = vst [vmem:[#allocation2 + $0x8] sm:$0x3f] %v375_v41 }
 0x10d   : > { %v379_v45 = vld [vmem:[#allocation2 + $0x8] sm:$0x3f] }
 0x119   : > { %v481_v42 = vpop.f32.mrb[4].mxu0 }
 0x11a   : > { %v488_v43 = vadd.f32 %v481_v42, %v374_v36  ;;  %v722_v44 = vpop.f32.mrb[5].mxu0 }
 0x11b   : > { %v484_v46 = vpop.f32.mrb[6].mxu0 }
 0x11c   : > { %v489_v47 = vadd.f32 %v484_v46, %v379_v45  ;;  %v723_v48 = vpop.f32.mrb[7].mxu0  ;;  %v503_v52 = vmul.f32 %v488_v43, %v488_v43 }
 0x11e   : > { %491 = vst [vmem:[#allocation2 + $0x8] sm:$0x3f] %v489_v47 }
 0x125   : > { %v493_v49 = vld [vmem:[#allocation2 + $0x8] sm:$0x3f] }
 0x126   : > { %v495_v50 = vsel %vm494_vm1, %v493_v49, 0.0  ;;  %v504_v51 = vmul.f32 %v493_v49, %v493_v49 }
 0x127   : > { %v496_v53 = vadd.f32 %v495_v50, %v488_v43 }
 0x128   : > { %v505_v54 = vsel %vm494_vm1, %v504_v51, 0.0 }
 0x129   : > { %v497_v55 = vrot.slane %v496_v53, 4  ;;  %v506_v56 = vadd.f32 %v505_v54, %v503_v52 }
 0x12b   : > { %v498_v57 = vadd.f32 %v497_v55, %v496_v53  ;;  %v507_v58 = vrot.slane %v506_v56, 4 }
 0x12d   : > { %v499_v59 = vrot.slane %v498_v57, 2  ;;  %v508_v60 = vadd.f32 %v507_v58, %v506_v56 }
 0x12f   : > { %v500_v61 = vadd.f32 %v499_v59, %v498_v57  ;;  %v509_v62 = vrot.slane %v508_v60, 2 }
 0x131   : > { %v501_v63 = vrot.slane %v500_v61, 1  ;;  %v510_v0 = vadd.f32 %v509_v62, %v508_v60 }
 0x133   : > { %v511_v1 = vrot.slane %v510_v0, 1  ;;  %v502_v2 = vadd.f32 %v501_v63, %v500_v61 }
 0x135   : > { %v512_v3 = vadd.f32 %v511_v1, %v510_v0 }
 0x137   : > { %v514_v4 = vsel %vm513_vm2, %v502_v2, %v512_v3 }
 0x138   : > { %515 = vst [vmem:[%s141_s14] sm:$0x3] %v514_v4 }
 0x139 PF: > { %s12_s9 = sadd.s32 1, %s765_s9  }
 0x13a   : > { %p9_p4 = scmp.ge.s32.totalorder %s12_s9, 4  }
 0x13c   :  { %11 = sbr.rel (!%p9_p4) target bundleno = 1 (0x1), region = 60 }

// kernel: cnn_block_forward.3
= control target key start
LH: loop header
LB: loop body
LE: loop exit
PB: predicated region body
PF: predicated region fallthrough
CT: control target
= control target key end

     0   :  { %s856_s15 = smov 0   ;;  %s985_s0 = inlined_call_operand.vmem [shape: bf16[2,16,128], index: 0, kind: input, shape index: {}]   ;;  %s986_s1 = inlined_call_operand.vmem [shape: bf16[3,128,128], index: 1, kind: input, shape index: {}]   ;;  %s987_s2 = inlined_call_operand.vmem [shape: f32[1,128], index: 2, kind: input, shape index: {}]   ;;  %s988_s3 = inlined_call_operand.vmem [shape: f32[1,128], index: 3, kind: input, shape index: {}]   ;;  %s989_s4 = inlined_call_operand.vmem [shape: f32[2,14,128], index: 4, kind: output, shape index: {}]  }
   0x1 LB: > { %s627_s16 = sadd.s32 4294967295, %s827_s15   ;;  %p631_p0 = scmp.ge.s32.totalorder %s827_s15, 1  ;;  %s827_s15 = sphi %s856_s15, %s14_s15  }
   0x2   : > { %p162_p1 = scmp.lt.s32.totalorder %s827_s15, 3 }
   0x4   : > { %p163_p2 = pnand %p631_p0, %p162_p1 }
   0x5   : > { %v796_v0 = vld [vmem:[%s986_s1] sm:$0xff] (!%p163_p2)   ;;  %v829_v1 = vmov (!%p163_p2), 0.0   ;;  %v797_v2 = vld [vmem:[%s986_s1 + $0x8] sm:$0xff] (!%p163_p2)   ;;  %vm830_vm0 = vmmov (!%p163_p2), 0   ;;  %p188_p3 = scmp.lt.s32.totalorder (!%p163_p2), %s627_s16, 1  ;;  %v798_v5 = vld [vmem:[%s986_s1 + $0x10] sm:$0xff] (!%p163_p2)  }
   0x6   : > { %166 = sbr.rel (%p163_p2) target bundleno = 301 (0x12d), region = 36  ;;  %726 = vmatprep.subr.bf16.mxu0 (!%p163_p2), %v829_v1  ;;  %746 = vmatprep.subr.bf16.mxu1 (!%p163_p2), %v829_v1  ;;  %v799_v3 = vld [vmem:[%s986_s1 + $0x40] sm:$0xff] (!%p163_p2)   ;;  %v801_v4 = vld [vmem:[%s986_s1 + $0x48] sm:$0xff] (!%p163_p2)   ;;  %v803_v6 = vld [vmem:[%s986_s1 + $0x50] sm:$0xff] (!%p163_p2)  }
   0x7   : > { %727 = vmatpush3.bf16.msra.mxu0 (!%p163_p2), %v796_v0  ;;  %742 = vmatprep.mubr.msk.bf16.mxu0 (!%p163_p2), %vm830_vm0, %v829_v1  ;;  %v800_v7 = vld [vmem:[%s986_s1 + $0x18] sm:$0xff] (!%p163_p2)   ;;  %v802_v9 = vld [vmem:[%s986_s1 + $0x20] sm:$0xff] (!%p163_p2)   ;;  %v804_v11 = vld [vmem:[%s986_s1 + $0x28] sm:$0xff] (!%p163_p2)  }
   0x8   : > { %728 = vmatprep.subr.bf16.mxu0 (!%p163_p2), %v829_v1  ;;  %762 = vmatprep.mubr.msk.bf16.mxu1 (!%p163_p2), %vm830_vm0, %v829_v1  ;;  %v805_v8 = vld [vmem:[%s986_s1 + $0x58] sm:$0xff] (!%p163_p2)   ;;  %v807_v10 = vld [vmem:[%s986_s1 + $0x60] sm:$0xff] (!%p163_p2)   ;;  %v809_v13 = vld [vmem:[%s986_s1 + $0x68] sm:$0xff] (!%p163_p2)  }
   0x9   : > { %747 = vmatpush3.bf16.msra.mxu1 (!%p163_p2), %v799_v3  ;;  %v806_v14 = vld [vmem:[%s986_s1 + $0x30] sm:$0xff] (!%p163_p2)   ;;  %v808_v17 = vld [vmem:[%s986_s1 + $0x38] sm:$0xff] (!%p163_p2)   ;;  %v812_v21 = vld [vmem:[%s986_s1 + $0x80] sm:$0xff] (!%p163_p2)  }
   0xa   : > { %748 = vmatprep.subr.bf16.mxu1 (!%p163_p2), %v829_v1  ;;  %v811_v16 = vld [vmem:[%s986_s1 + $0x70] sm:$0xff] (!%p163_p2)   ;;  %v813_v20 = vld [vmem:[%s986_s1 + $0x78] sm:$0xff] (!%p163_p2)   ;;  %v814_v23 = vld [vmem:[%s986_s1 + $0x88] sm:$0xff] (!%p163_p2)  }
   0xb   : > { %729 = vmatpush3.bf16.msra.mxu0 (!%p163_p2), %v797_v2  ;;  %v815_v24 = vld [vmem:[%s986_s1 + $0x90] sm:$0xff] (!%p163_p2)   ;;  %v816_v25 = vld [vmem:[%s986_s1 + $0x98] sm:$0xff] (!%p163_p2)   ;;  %v817_v26 = vld [vmem:[%s986_s1 + $0xa0] sm:$0xff] (!%p163_p2)  }
   0xc   : > { %730 = vmatprep.subr.bf16.mxu0 (!%p163_p2), %v829_v1  ;;  %v818_v27 = vld [vmem:[%s986_s1 + $0xa8] sm:$0xff] (!%p163_p2)   ;;  %v819_v28 = vld [vmem:[%s986_s1 + $0xb0] sm:$0xff] (!%p163_p2)   ;;  %v820_v29 = vld [vmem:[%s986_s1 + $0xb8] sm:$0xff] (!%p163_p2)  }
   0xd   : > { %s991_s16 = smov (!%p188_p3, %s627_s16), 1  ;;  %749 = vmatpush3.bf16.msra.mxu1 %v801_v4  ;;  %v693_v43 = vld [vmem:[%s987_s2] ss:$0 sm:$0xff] }
   0xe   : > { %750 = vmatprep.subr.bf16.mxu1 %v829_v1  ;;  %s697_s5 = sshll.u32 %s991_s16, 3  ;;  %v694_v46 = vld [vmem:[%s988_s3] ss:$0 sm:$0xff]  ;;  %s698_s25 = sshll.u32 %s991_s16, 4 }
   0xf   : > { %731 = vmatpush3.bf16.msra.mxu0 %v798_v5  ;;  %s192_s10 = scalar_lea.vmem %s985_s0, %s697_s5  ;;  %s197_s28 = scalar_lea.vmem %s989_s4, %s698_s25 }
  0x10   : > { %732 = vmatprep.subr.bf16.mxu0 %v829_v1  ;;  %v810_v12 = vld [vmem:[%s192_s10] sm:$0xff]  }
  0x11   : > { %751 = vmatpush3.bf16.msra.mxu1 %v803_v6  ;;  %v336_v15 = vshll.u32 %v810_v12, 16  ;;  %v334_v18 = vshrl.u32 %v810_v12, 16  ;;  %v453_v30 = vrot.slane %v810_v12, 1 }
  0x12   : > { %752 = vmatprep.subr.bf16.mxu1 %v829_v1 }
  0x13   : > { %733 = vmatpush3.bf16.msra.mxu0 %v800_v7  ;;  %v338_v19 = vrot.slane %v336_v15, 1 }
  0x14   : > { %734 = vmatprep.subr.bf16.mxu0 %v829_v1 }
  0x15   : > { %753 = vmatpush3.bf16.msra.mxu1 %v805_v8  ;;  %v339_v22 = vor.u32 %v338_v19, %v334_v18 }
  0x16   : > { %754 = vmatprep.subr.bf16.mxu1 %v829_v1 }
  0x17   : > { %735 = vmatpush3.bf16.msra.mxu0 %v802_v9 }
  0x18   : > { %736 = vmatprep.subr.bf16.mxu0 %v829_v1 }
  0x19   : > { %755 = vmatpush3.bf16.msra.mxu1 %v807_v10 }
  0x1a   : > { %756 = vmatprep.subr.bf16.mxu1 %v829_v1 }
  0x1b   : > { %737 = vmatpush3.bf16.msra.mxu0 %v804_v11 }
  0x1c   : > { %738 = vmatprep.subr.bf16.mxu0 %v829_v1 }
  0x1d   : > { %757 = vmatpush3.bf16.msra.mxu1 %v809_v13 }
  0x1e   : > { %758 = vmatprep.subr.bf16.mxu1 %v829_v1 }
  0x1f   : > { %739 = vmatpush3.bf16.msra.mxu0 %v806_v14 }
  0x20   : > { %740 = vmatprep.subr.bf16.mxu0 %v829_v1 }
  0x21   : > { %759 = vmatpush3.bf16.msra.mxu1 %v811_v16 }
  0x22   : > { %760 = vmatprep.subr.bf16.mxu1 %v829_v1 }
  0x23   : > { %741 = vmatpush3.bf16.msra.mxu0 %v808_v17 }
  0x24   : > { %766 = vmatprep.subr.bf16.mxu0 %v829_v1 }
  0x25   : > { %761 = vmatpush3.bf16.msra.mxu1 %v813_v20 }
  0x26   : > { %743 = vmatmul.mubr.bf16.vlgmr.msra.gmra.mrb[0].mxu0 %v810_v12 }
  0x27   : > { %767 = vmatpush3.bf16.msra.mxu0 %v812_v21  ;;  %782 = vmatprep.mubr.msk.bf16.mxu0 %vm830_vm0, %v829_v1 }
  0x28   : > { %768 = vmatprep.subr.bf16.mxu0 %v829_v1  ;;  %763 = vmatmul.mubr.bf16.vlgmr.msra.gmra.mrb[0].mxu1 %v339_v22 }
  0x2b   : > { %769 = vmatpush3.bf16.msra.mxu0 %v814_v23 }
  0x2c   : > { %770 = vmatprep.subr.bf16.mxu0 %v829_v1 }
  0x2f   : > { %771 = vmatpush3.bf16.msra.mxu0 %v815_v24 }
  0x30   : > { %772 = vmatprep.subr.bf16.mxu0 %v829_v1 }
  0x33   : > { %773 = vmatpush3.bf16.msra.mxu0 %v816_v25 }
  0x34   : > { %774 = vmatprep.subr.bf16.mxu0 %v829_v1 }
  0x37   : > { %775 = vmatpush3.bf16.msra.mxu0 %v817_v26 }
  0x38   : > { %776 = vmatprep.subr.bf16.mxu0 %v829_v1 }
  0x3b   : > { %777 = vmatpush3.bf16.msra.mxu0 %v818_v27 }
  0x3c   : > { %778 = vmatprep.subr.bf16.mxu0 %v829_v1 }
  0x3f   : > { %779 = vmatpush3.bf16.msra.mxu0 %v819_v28 }
  0x40   : > { %780 = vmatprep.subr.bf16.mxu0 %v829_v1 }
  0x43   : > { %781 = vmatpush3.bf16.msra.mxu0 %v820_v29 }
  0x46   : > { %783 = vmatmul.mubr.bf16.vlgmr.msra.gmra.mrb[4].mxu0 %v453_v30 }
  0xf9   : > { %v305_v31 = vpop.f32.mrb[0].mxu0 }
  0xfa   : > { %v744_v32 = vpop.f32.mrb[1].mxu0 }
  0xfb   : > { %v308_v33 = vpop.f32.mrb[2].mxu0  ;;  %v423_v35 = vpop.f32.mrb[0].mxu1 }
  0xfc   : > { %313 = vst [vmem:[#allocation2 + $0x8] sm:$0x3f] %v308_v33  ;;  %v745_v34 = vpop.f32.mrb[3].mxu0  ;;  %v430_v36 = vadd.f32 %v423_v35, %v305_v31  ;;  %v764_v37 = vpop.f32.mrb[1].mxu1 }
  0xfd   : > { %v426_v38 = vpop.f32.mrb[2].mxu1 }
  0xfe   : > { %v765_v39 = vpop.f32.mrb[3].mxu1 }
 0x103   : > { %v315_v40 = vld [vmem:[#allocation2 + $0x8] sm:$0x3f] }
 0x104   : > { %v431_v41 = vadd.f32 %v426_v38, %v315_v40 }
 0x106   : > { %433 = vst [vmem:[#allocation2 + $0x8] sm:$0x3f] %v431_v41 }
 0x10d   : > { %v435_v47 = vld [vmem:[#allocation2 + $0x8] sm:$0x3f] }
 0x119   : > { %v537_v42 = vpop.f32.mrb[4].mxu0 }
 0x11a   : > { %v544_v44 = vadd.f32 %v537_v42, %v430_v36  ;;  %v784_v45 = vpop.f32.mrb[5].mxu0 }
 0x11b   : > { %v540_v48 = vpop.f32.mrb[6].mxu0 }
 0x11c   : > { %v557_v49 = vmul.f32 %v693_v43, %v544_v44  ;;  %v545_v50 = vadd.f32 %v540_v48, %v435_v47  ;;  %v785_v51 = vpop.f32.mrb[7].mxu0 }
 0x11e   : > { %v566_v52 = vadd.f32 %v694_v46, %v557_v49  ;;  %547 = vst [vmem:[#allocation2 + $0x8] sm:$0x3f] %v545_v50 }
 0x120   : > { %v568_v53 = vmax.f32 %v566_v52, 0.0 }
 0x122   : > { %570 = vst [vmem:[%s197_s28] sm:$0xff] %v568_v53 }
 0x125   : > { %v549_v54 = vld [vmem:[#allocation2 + $0x8] sm:$0x3f] }
 0x126   : > { %v558_v55 = vmul.f32 %v693_v43, %v549_v54 }
 0x128   : > { %v567_v56 = vadd.f32 %v694_v46, %v558_v55 }
 0x12a   : > { %v569_v57 = vmax.f32 %v567_v56, 0.0 }
 0x12c   : > { %571 = vst [vmem:[%s197_s28 + $0x8] sm:$0x3f] %v569_v57 }
 0x12d PF: > { %s14_s15 = sadd.s32 1, %s827_s15  }
 0x12e   : > { %p11_p4 = scmp.ge.s32.totalorder %s14_s15, 4  }
 0x130   :  { %13 = sbr.rel (!%p11_p4) target bundleno = 1 (0x1), region = 68 }

</bundles_post_ra>
